<compile_context>
chip_gen: v5e
topology: v5e:2x2
jax: 0.10.0
libtpu: 0.0.40
codegen_flags: <defaults>
</compile_context>

<pallas_src>
import functools

import jax
import jax.numpy as jnp
from jax.experimental import pallas as pl
from jax.experimental.pallas import tpu as pltpu

_LANE = 128
_MAX_WIDTH = 32 * _LANE  # cap the slab width at 4096 lanes-worth


def _sublane_packing(dtype):
    itemsize = jnp.dtype(dtype).itemsize
    if itemsize >= 4:
        return 8
    if itemsize == 2:
        return 16
    return 32


def _generation_config():
    """Returns (target_block_bytes, vmem_limit_bytes or None) for the local TPU."""
    kind = ""
    try:
        kind = jax.devices()[0].device_kind.lower()
    except Exception:
        pass
    if "v7" in kind:
        # 3.2 TB/s HBM: bigger blocks amortize the ~0.35us/step overhead.
        # 2 refs x 2 buffers x 6 MiB = 24 MiB, well under a 48 MiB scoped
        # limit and the 64 MiB physical VMEM.
        return 6 << 20, 48 << 20
    if "v6" in kind:
        return 4 << 20, 32 << 20
    if "v5" in kind and ("lite" in kind or "v5e" in kind):
        # v5e: 16 MiB default scoped VMEM; 4 x 2 MiB = 8 MiB fits the default.
        return 2 << 20, None
    if "v5" in kind:  # v5p
        return 4 << 20, 32 << 20
    # v2/v3/v4/unknown: stay conservative and keep compiler defaults.
    return 2 << 20, None


def _choose_width(n_work):
    # Largest width = k*128 (<= 4096) that evenly divides n_work.
    m = n_work // _LANE
    for k in range(min(m, _MAX_WIDTH // _LANE), 0, -1):
        if m % k == 0:
            return k * _LANE
    return _LANE


def _choose_block_rows(rows, width, itemsize, pack, target_bytes):
    """Block sublane count: ~target_bytes per block, multiple of `pack`,
    preferably an exact divisor of `rows` (identical unmasked steps), and
    small enough that the grid has >= 2 steps (pipelining + v7x megacore)."""
    if rows <= pack:
        return rows  # tiny slab: single full-extent block (always legal)

    row_bytes = width * itemsize
    target = max(target_bytes // row_bytes, pack)
    target = (target // pack) * pack

    half = max((rows // 2) // pack * pack, pack)
    cap = min(target, half)

    # Search for an exact divisor of `rows` within 2x of the byte target;
    # otherwise fall back to a cdiv grid with one masked tail block.
    lo = max(pack, (cap // 2) // pack * pack)
    d = cap
    while d >= lo:
        if rows % d == 0:
            return d
        d -= pack
    return cap


def _sigmoid_beta_kernel(x_ref, o_ref, *, alpha):
    # Upcast to f32 (free: the kernel is HBM-bound, compute is hidden) and
    # lower sigmoid via a single EUP tanh instead of exp + full divide:
    #   sigmoid(a*x) = 0.5 * tanh(0.5*a*x) + 0.5
    x = x_ref[...].astype(jnp.float32)
    y = 0.5 * jnp.tanh((0.5 * alpha) * x) + 0.5
    o_ref[...] = y.astype(o_ref.dtype)


def _sigmoid_beta_2d(x2d, alpha, block_rows, vmem_limit):
    rows, width = x2d.shape
    dtype = x2d.dtype
    itemsize = jnp.dtype(dtype).itemsize
    n_work = rows * width
    grid = (pl.cdiv(rows, block_rows),)

    cp_kwargs = dict(dimension_semantics=("parallel",))
    if vmem_limit is not None:
        cp_kwargs["vmem_limit_bytes"] = int(vmem_limit)

    kernel = functools.partial(_sigmoid_beta_kernel, alpha=float(alpha))
    return pl.pallas_call(
        kernel,
        out_shape=jax.ShapeDtypeStruct((rows, width), dtype),
        grid=grid,
        in_specs=[pl.BlockSpec((block_rows, width), lambda i: (i, 0))],
        out_specs=pl.BlockSpec((block_rows, width), lambda i: (i, 0)),
        compiler_params=pltpu.CompilerParams(**cp_kwargs),
        cost_estimate=pl.CostEstimate(
            flops=3 * n_work,           # scale + tanh post-scale/offset
            transcendentals=n_work,     # one tanh per element
            bytes_accessed=2 * n_work * itemsize,
        ),
    )(x2d)


def sigmoid_beta_forward(x, alpha=1.0):
    """JAX/Pallas equivalent of sigmoid_beta.forward.

    alpha is a (non-trained) module parameter known at trace time, so the
    `alpha == 0.0` identity branch is resolved in Python, mirroring PyTorch.
    """
    # TODO(synk): if alpha ever becomes a traced/learned array, pass it as an
    # SMEM scalar operand instead of baking it in as a trace-time constant.
    if float(alpha) == 0.0:
        return x

    orig_shape = x.shape
    dtype = x.dtype
    itemsize = jnp.dtype(dtype).itemsize
    pack = _sublane_packing(dtype)
    target_bytes, vmem_limit = _generation_config()

    flat = x.reshape(-1)
    n = flat.shape[0]
    if n == 0:
        return x

    def _tail_sigmoid(t):
        tf = t.astype(jnp.float32)
        return (0.5 * jnp.tanh((0.5 * float(alpha)) * tf) + 0.5).astype(dtype)

    n_main = (n // _LANE) * _LANE
    if n_main == 0:
        # Fewer than 128 elements: a Pallas launch is pure overhead.
        return _tail_sigmoid(flat).reshape(orig_shape)

    if n_main == n:
        main = flat
    else:
        # Largest 128-aligned prefix goes through the kernel; the <128-element
        # tail is handled in plain jnp and stitched back (no whole-tensor
        # pad + slice-back round trip).
        main = flat[:n_main]

    width = _choose_width(n_main)
    rows = n_main // width
    block_rows = _choose_block_rows(rows, width, itemsize, pack, target_bytes)

    out_main = _sigmoid_beta_2d(
        main.reshape(rows, width), alpha, block_rows, vmem_limit
    ).reshape(-1)

    if n_main == n:
        return out_main.reshape(orig_shape)
    out = jnp.concatenate([out_main, _tail_sigmoid(flat[n_main:])])
    return out.reshape(orig_shape)


if __name__ == "__main__":
    key = jax.random.PRNGKey(0)
    k1, k2, k3 = jax.random.split(key, 3)

    alpha = 1.0  # deterministic parameter init, matching nn.Parameter(tensor(1.0))

    # Small NCHW-like activation tensor, consistent with a conv-SNN feature map.
    x = jax.random.normal(k1, (2, 4, 16, 16), dtype=jnp.float32)
    y = jax.block_until_ready(sigmoid_beta_forward(x, alpha=alpha))
    ref = jax.nn.sigmoid(alpha * x)
    assert y.shape == x.shape and y.dtype == x.dtype
    assert jnp.allclose(y, ref, atol=1e-6), "mismatch vs reference (f32 aligned path)"

    # alpha == 0 identity branch.
    y0 = jax.block_until_ready(sigmoid_beta_forward(x, alpha=0.0))
    assert jnp.array_equal(y0, x)

    # Unaligned element count: 128-aligned prefix via the kernel + jnp tail.
    x_odd = jax.random.normal(k2, (7, 130), dtype=jnp.float32)
    y_odd = jax.block_until_ready(sigmoid_beta_forward(x_odd, alpha=2.5))
    ref_odd = jax.nn.sigmoid(2.5 * x_odd)
    assert jnp.allclose(y_odd, ref_odd, atol=1e-6), "mismatch vs reference (prefix+tail path)"

    # Tiny (<128 element) tensor: pure-jnp fallback.
    x_tiny = jax.random.normal(k3, (3, 5, 7), dtype=jnp.float32)
    y_tiny = jax.block_until_ready(sigmoid_beta_forward(x_tiny, alpha=0.7))
    assert jnp.allclose(y_tiny, jax.nn.sigmoid(0.7 * x_tiny), atol=1e-6)

    # bf16 input: f32 compute inside the kernel, cast back on store.
    x_bf = jax.random.normal(k1, (4, 8, 64), dtype=jnp.bfloat16)
    y_bf = jax.block_until_ready(sigmoid_beta_forward(x_bf, alpha=1.3))
    ref_bf = jax.nn.sigmoid(1.3 * x_bf.astype(jnp.float32))
    assert y_bf.dtype == jnp.bfloat16
    assert jnp.allclose(y_bf.astype(jnp.float32), ref_bf, atol=1e-2), "mismatch (bf16 path)"

    print("KERNEL_OK")
</pallas_src>

<mosaic_0001>
module attributes {stable_mosaic.version = 11 : i64} {
  func.func @_sigmoid_beta_kernel(%arg0: i32, %arg1: memref<1x2048xf32, #tpu.memory_space<vmem>>, %arg2: memref<1x2048xf32, #tpu.memory_space<vmem>>) attributes {dimension_semantics = [#tpu.dimension_semantics<parallel>], iteration_bounds = array<i64: 1>, scalar_prefetch = 0 : i64, scratch_operands = 0 : i64, tpu.core_type = #tpu.core_type<tc>, window_params = [{transform_indices = @transform_0, window_bounds = array<i64: 1, 2048>}, {transform_indices = @transform_1, window_bounds = array<i64: 1, 2048>}]} {
    %c0 = arith.constant 0 : index
    %c0_0 = arith.constant 0 : index
    %0 = vector.load %arg1[%c0, %c0_0] : memref<1x2048xf32, #tpu.memory_space<vmem>>, vector<1x2048xf32>
    %cst = arith.constant 5.000000e-01 : f32
    %1 = vector.broadcast %cst : f32 to vector<1x2048xf32>
    %2 = arith.mulf %1, %0 : vector<1x2048xf32>
    %3 = math.tanh %2 : vector<1x2048xf32>
    %cst_1 = arith.constant 5.000000e-01 : f32
    %4 = vector.broadcast %cst_1 : f32 to vector<1x2048xf32>
    %5 = arith.mulf %4, %3 : vector<1x2048xf32>
    %cst_2 = arith.constant 5.000000e-01 : f32
    %6 = vector.broadcast %cst_2 : f32 to vector<1x2048xf32>
    %7 = arith.addf %5, %6 : vector<1x2048xf32>
    %c0_3 = arith.constant 0 : index
    %c0_4 = arith.constant 0 : index
    %8 = vector.load %arg2[%c0_3, %c0_4] : memref<1x2048xf32, #tpu.memory_space<vmem>>, vector<1x2048xf32>
    tpu.vector_store %arg2[%c0_3, %c0_4], %7 {strides = array<i32>} : memref<1x2048xf32, #tpu.memory_space<vmem>>, vector<1x2048xf32>,
    return
  }
  func.func @transform_0(%arg0: i32) -> (i32, i32) {
    %c0_i32 = arith.constant 0 : i32
    %c0_i32_0 = arith.constant 0 : i32
    return %arg0, %c0_i32 : i32, i32
  }
  func.func @transform_1(%arg0: i32) -> (i32, i32) {
    %c0_i32 = arith.constant 0 : i32
    %c0_i32_0 = arith.constant 0 : i32
    return %arg0, %c0_i32 : i32, i32
  }
}

</mosaic_0001>

<bundles_post_ra>
// kernel: tpu_custom_call.1
= control target key start
LH: loop header
LB: loop body
LE: loop exit
PB: predicated region body
PF: predicated region fallthrough
CT: control target
= control target key end

     0   :  { %6 = vsyncpa [#allocation3], 0  ;;  %s128_s0 = inlined_call_operand.hbm [shape: f32[1,2048], index: 0, kind: input, shape index: {}]   ;;  %s129_s1 = inlined_call_operand.hbm [shape: f32[1,2048], index: 1, kind: output, shape index: {}]  }
   0x1   :  { %7 = vsyncpa [#allocation4], 0  ;;  %s13_s8 = sshll.u32 %s128_s0, 4  ;;  %s110_s9 = smov [#allocation2]   ;;  %s14_s8 = int_to_ptr.hbm [resolvable:$true] %s13_s8 }
   0x2   :  { %s15_s10 = sshll.u32 %s110_s9, 4  ;;  %s16_s10 = int_to_ptr.vmem [resolvable:$true] %s15_s10 }
   0x3   :  { %18 = dma.hbm_to_vmem [thread:$0]  %s14_s8, 256, %s16_s10, [#allocation3]  }
   0x4   :  { %106 = dma.done.wait [#allocation3], 256  }
   0x5   :  { %107 = vsyncadd [#allocation3], 4294967040  ;;  %v23_v0 = vld [vmem:[#allocation2] sm:$0xff]  ;;  %v24_v1 = vld [vmem:[#allocation2 + $0x8] sm:$0xff]  ;;  %s111_s11 = smov [#allocation5]   ;;  %s42_s14 = sshll.u32 %s129_s1, 4  ;;  %s43_s14 = int_to_ptr.hbm [resolvable:$true] %s42_s14 }
   0x6   :  { %v25_v2 = vmul.f32 0.5, %v23_v0  ;;  %v26_v3 = vmul.f32 0.5, %v24_v1  ;;  %s40_s12 = sshll.u32 %s111_s11, 4  ;;  %s41_s12 = int_to_ptr.vmem [resolvable:$true] %s40_s12 }
   0x8   :  { %54 = vtanh.f32 %v25_v2 }
   0x9   :  { %56 = vtanh.f32 %v26_v3 }
   0xe   :  { %v55_v4 = vpop.eup %54 }
   0xf   :  { %v57_v5 = vpop.eup %56  ;;  %v29_v6 = vmul.f32 0.5, %v55_v4 }
  0x10   :  { %v30_v7 = vmul.f32 0.5, %v57_v5 }
  0x11   :  { %v31_v8 = vadd.f32 0.5, %v29_v6 }
  0x12   :  { %v32_v9 = vadd.f32 0.5, %v30_v7 }
  0x13   :  { %33 = vst [vmem:[#allocation5] sm:$0xff] %v31_v8 }
  0x14   :  { %34 = vst [vmem:[#allocation5 + $0x8] sm:$0xff] %v32_v9 }
  0x15   :  { %45 = dma.vmem_to_hbm [thread:$0]  %s41_s12, 256, %s43_s14, [#allocation4]  }
  0x16   :  { %108 = dma.done.wait [#allocation4], 256  }
  0x17   :  { %109 = vsyncadd [#allocation4], 4294967040 }
  0x18   :  { %50 = vsyncpa [#allocation3], 1 }
  0x19   :  { %51 = vsyncpa [#allocation4], 1 }

</bundles_post_ra>
